<compile_context>
chip_gen: v7x
topology: tpu7x:2x2x1
jax: 0.10.0
libtpu: 0.0.40
codegen_flags: <defaults>
</compile_context>

<pallas_src>
import functools

import jax
import jax.numpy as jnp
from jax.experimental import pallas as pl
from jax.experimental.pallas import tpu as pltpu

BN_EPS = 1e-5

# Below this output size a single fused (phase-gridded) kernel wins: it removes one
# launch, the stats HBM round-trip and a second weight DMA.  Above it, the two-pass
# version keeps the batch axis 'parallel' so v7x's two TensorCores are both used
# (single-TC v5e/v6e are indifferent, so they effectively always take the fused
# path for realistic WGAN feature maps).
_FUSE_MAX_OUT_BYTES = 8 * 1024 * 1024


def _vmem_limit_bytes():
    """Scoped-VMEM budget derived from the chip (v5e/v6e: 128 MiB, v7x: 64 MiB/TC)."""
    cap = 64 * 1024 * 1024  # conservative default == v7x per-TC VMEM
    try:
        cap = int(getattr(pltpu.get_tpu_info(), "vmem_capacity_bytes", cap))
    except Exception:
        pass
    # ~25% headroom for compiler-internal scratch; never below the old 32 MiB.
    return max(32 * 1024 * 1024, min(cap * 3 // 4, 100 * 1024 * 1024))


def _pick_l_tile(hw, c_in, c_out, in_itemsize, out_itemsize, vmem_limit):
    """Largest spatial (lane) tile whose double-buffered blocks fit the VMEM budget.

    Ideally LT == HW (one grid step per batch image): fewer, fatter steps amortize
    the ~600-cycle per-step overhead and give large lane-dense DMA bursts.
    """
    bytes_per_lane = 2 * (c_in * in_itemsize + c_out * out_itemsize)  # 2x double buffer
    budget = int(vmem_limit * 0.6)  # rest: weights, scratch, semaphores, headroom
    max_lt = max(128, budget // bytes_per_lane)
    if hw <= max_lt:
        return hw
    best = 0
    t = 128
    while t <= max_lt:  # largest 128-multiple divisor -> unmasked lane-dense vst
        if hw % t == 0:
            best = t
        t += 128
    if best:
        return best
    # No 128-multiple divisor fits: take the largest divisor that does (masked
    # stores but stays inside VMEM -- important on v7x's 64 MiB).
    best, d = 1, 1
    while d * d <= hw:
        if hw % d == 0:
            if d <= max_lt:
                best = max(best, d)
            if hw // d <= max_lt:
                best = max(best, hw // d)
        d += 1
    return best


# --------------------------- fused single-call kernel ---------------------------


def _fused_kernel(count, x_ref, w_ref, g_ref, b_ref, o_ref,
                  sum_ref, ssq_ref, scale_ref, shift_ref):
    """1x1 conv + training-mode BN in one pallas_call.

    Grid = (phase, batch, spatial-tile), all 'arbitrary' (sequential):
      phase 0 : accumulate per-channel sum / sum-of-squares of y = W @ x.
      boundary: first phase-1 step turns the stats into BN scale/shift.
      phase 1 : y = (scale*W) @ x + shift, written straight to HBM.
    """
    phase = pl.program_id(0)
    first = jnp.logical_and(pl.program_id(1) == 0, pl.program_id(2) == 0)

    @pl.when(jnp.logical_and(phase == 0, first))
    def _init():
        sum_ref[...] = jnp.zeros_like(sum_ref)
        ssq_ref[...] = jnp.zeros_like(ssq_ref)

    @pl.when(phase == 0)
    def _stats():
        y = jnp.dot(w_ref[...], x_ref[...], preferred_element_type=jnp.float32)
        sum_ref[...] += jnp.sum(y, axis=1, keepdims=True)
        ssq_ref[...] += jnp.sum(y * y, axis=1, keepdims=True)

    @pl.when(jnp.logical_and(phase == 1, first))
    def _finalize_stats():
        mean = sum_ref[...] / count
        # Note: E[y^2]-mean^2 in f32 (can lose precision if |mean| >> std; fine for BN).
        var = ssq_ref[...] / count - mean * mean
        scale = g_ref[...] * jax.lax.rsqrt(var + BN_EPS)
        scale_ref[...] = scale
        shift_ref[...] = b_ref[...] - mean * scale

    @pl.when(phase == 1)
    def _apply():
        w_s = (w_ref[...] * scale_ref[...]).astype(x_ref.dtype)  # fold BN scale into W
        y = jnp.dot(w_s, x_ref[...], preferred_element_type=jnp.float32)
        o_ref[...] = (y + shift_ref[...]).astype(o_ref.dtype)


# ------------------------------- two-pass kernels -------------------------------


def _stats_kernel(x_ref, w_ref, st_ref):
    """Pass 1: per-image channel stats, accumulated in-kernel across spatial tiles
    (output block resident over the 'arbitrary' l axis; one packed writeback)."""
    @pl.when(pl.program_id(1) == 0)
    def _init():
        st_ref[...] = jnp.zeros_like(st_ref)

    y = jnp.dot(w_ref[...], x_ref[...], preferred_element_type=jnp.float32)
    st_ref[...] += jnp.concatenate(
        [jnp.sum(y, axis=1, keepdims=True), jnp.sum(y * y, axis=1, keepdims=True)],
        axis=1)


def _apply_kernel(x_ref, w_ref, shift_ref, o_ref):
    """Pass 2: y = (scale*W) @ x + shift (BN scale pre-folded into W)."""
    y = jnp.dot(w_ref[...], x_ref[...], preferred_element_type=jnp.float32)
    o_ref[...] = (y + shift_ref[...]).astype(o_ref.dtype)


# ----------------------------------- driver -------------------------------------


def _conv1x1_bn(x3, w_f32, gamma, beta, *, compute_dtype, force_impl=None,
                lane_tile=None):
    """x3: (N, C_in, HW) in compute dtype -> (N, C_out, HW) f32. 1x1 conv + train BN."""
    n, c_in, hw = x3.shape
    c_out = w_f32.shape[0]
    out_dtype = jnp.float32  # flip to bf16 here if downstream tolerates it
    vmem_limit = _vmem_limit_bytes()

    if lane_tile is None:
        lt = _pick_l_tile(hw, c_in, c_out, jnp.dtype(compute_dtype).itemsize,
                          jnp.dtype(out_dtype).itemsize, vmem_limit)
    else:
        assert hw % lane_tile == 0
        lt = lane_tile
    n_lt = hw // lt

    out_bytes = n * c_out * hw * jnp.dtype(out_dtype).itemsize
    fused = (out_bytes <= _FUSE_MAX_OUT_BYTES) if force_impl is None \
        else (force_impl == "fused")

    w_c = w_f32.astype(compute_dtype)

    if fused:
        return pl.pallas_call(
            functools.partial(_fused_kernel, float(n * hw)),
            out_shape=jax.ShapeDtypeStruct((n, c_out, hw), out_dtype),
            grid=(2, n, n_lt),
            in_specs=[
                pl.BlockSpec((pl.Squeezed(), c_in, lt), lambda p, i, l: (i, 0, l)),
                pl.BlockSpec((c_out, c_in), lambda p, i, l: (0, 0)),
                pl.BlockSpec((c_out, 1), lambda p, i, l: (0, 0)),
                pl.BlockSpec((c_out, 1), lambda p, i, l: (0, 0)),
            ],
            # Phase 0 pins the (never-written) output to block (0,.,0) so it stays
            # resident and is never flushed; phase 1 revisits that block first and
            # then walks the real blocks, so only correct data ever reaches HBM.
            out_specs=pl.BlockSpec((pl.Squeezed(), c_out, lt),
                                   lambda p, i, l: (i * p, 0, l * p)),
            scratch_shapes=[pltpu.VMEM((c_out, 1), jnp.float32)] * 4,
            compiler_params=pltpu.CompilerParams(
                dimension_semantics=("arbitrary", "arbitrary", "arbitrary"),
                vmem_limit_bytes=vmem_limit),
        )(x3, w_c, gamma.reshape(c_out, 1), beta.reshape(c_out, 1))

    # ----- Two-pass path: keeps the batch axis 'parallel' for v7x megacore. -----
    stats = pl.pallas_call(
        _stats_kernel,
        out_shape=jax.ShapeDtypeStruct((n, c_out, 2), jnp.float32),
        grid=(n, n_lt),
        in_specs=[
            pl.BlockSpec((pl.Squeezed(), c_in, lt), lambda i, l: (i, 0, l)),
            pl.BlockSpec((c_out, c_in), lambda i, l: (0, 0)),
        ],
        out_specs=pl.BlockSpec((pl.Squeezed(), c_out, 2), lambda i, l: (i, 0, 0)),
        compiler_params=pltpu.CompilerParams(
            dimension_semantics=("parallel", "arbitrary"),
            vmem_limit_bytes=vmem_limit),
    )(x3, w_c)

    count = jnp.float32(n * hw)
    mean = jnp.sum(stats[:, :, 0], axis=0) / count
    var = jnp.sum(stats[:, :, 1], axis=0) / count - mean * mean
    scale = gamma * jax.lax.rsqrt(var + BN_EPS)            # (C_out,)
    shift = beta - mean * scale                            # (C_out,)
    w_scaled = (w_f32 * scale[:, None]).astype(compute_dtype)

    return pl.pallas_call(
        _apply_kernel,
        out_shape=jax.ShapeDtypeStruct((n, c_out, hw), out_dtype),
        grid=(n, n_lt),
        in_specs=[
            pl.BlockSpec((pl.Squeezed(), c_in, lt), lambda i, l: (i, 0, l)),
            pl.BlockSpec((c_out, c_in), lambda i, l: (0, 0)),
            pl.BlockSpec((c_out, 1), lambda i, l: (0, 0)),
        ],
        out_specs=pl.BlockSpec((pl.Squeezed(), c_out, lt), lambda i, l: (i, 0, l)),
        compiler_params=pltpu.CompilerParams(
            dimension_semantics=("parallel", "parallel"),
            vmem_limit_bytes=vmem_limit),
    )(x3, w_scaled, shift.reshape(c_out, 1))


def up_or_trans_forward(x, params, mode="trans", scale_factor=2,
                        compute_dtype=None, force_impl=None, lane_tile=None):
    """Forward pass of UpOrTrans (kernel_size=1, stride=1, padding=0, batch_norm=True).

    x: (N, C_in, H, W) float32, NCHW like PyTorch.
    compute_dtype: dtype of the MXU operands (default f32; bf16 halves HBM bytes,
      accumulation / stats / output stay f32).
    force_impl: None (size heuristic) | 'fused' | 'two_pass'.
    lane_tile: optional spatial-tile override (testing / tuning).
    """
    N, C_in, H, W = x.shape

    if mode == "up":
        # nn.Conv2d weight (C_out, C_in, 1, 1).  Bias dropped: training-mode BN
        # subtracts the per-channel mean right after, so it cancels exactly.
        w_mat = params["conv_w"][:, :, 0, 0]
    elif mode == "trans":
        # nn.ConvTranspose2d weight (C_in, C_out, 1, 1); for k=1/s=1/p=0:
        # y[co] = sum_ci W[ci, co] * x[ci].  Bias dropped (cancels in BN).
        w_mat = params["trans_w"][:, :, 0, 0].T
    else:
        raise ValueError(mode)
    # TODO(synk): kernel_size>1 / stride>1 conv paths and eval-mode BN (running
    # stats) are not implemented; only the module's default 1x1 training config.

    C_out = w_mat.shape[0]
    cdt = jnp.dtype(compute_dtype) if compute_dtype is not None else jnp.float32
    x3 = x.reshape(N, C_in, H * W).astype(cdt)   # free reshape: lane-dense HW

    out3 = _conv1x1_bn(
        x3,
        w_mat.astype(jnp.float32),
        params["bn_gamma"].astype(jnp.float32),
        params["bn_beta"].astype(jnp.float32),
        compute_dtype=cdt, force_impl=force_impl, lane_tile=lane_tile)
    out = out3.reshape(N, C_out, H, W)           # free reshape back to NCHW

    if mode == "up":
        # Nearest-neighbor x2 upsample commutes with the 1x1 conv and leaves the
        # per-channel batch statistics unchanged, so it runs AFTER conv+BN (4x less
        # data through the kernels).  Single broadcast+reshape = one XLA copy pass.
        # TODO(synk): fuse the replication into the apply phase (interleaved lane
        # stores into an (N,C,H,2,2W) output) to also skip the small-Y round-trip.
        s = scale_factor
        out = jnp.broadcast_to(out[:, :, :, None, :, None],
                               (N, C_out, H, s, W, s)).reshape(N, C_out, s * H, s * W)
    return out


# --------------------------------- validation -----------------------------------


def _reference_forward(x, params, mode="trans", scale_factor=2):
    """Pure-JAX reference mirroring the PyTorch module (training-mode BN, with bias,
    upsample BEFORE conv) -- validates the bias-cancellation and commutation tricks."""
    if mode == "up":
        x = jnp.repeat(jnp.repeat(x, scale_factor, axis=2), scale_factor, axis=3)
        w_mat = params["conv_w"][:, :, 0, 0]
        bias = params["conv_b"]
    else:
        w_mat = params["trans_w"][:, :, 0, 0].T
        bias = params["trans_b"]
    y = jnp.einsum("oc,nchw->nohw", w_mat, x) + bias[None, :, None, None]
    mean = jnp.mean(y, axis=(0, 2, 3), keepdims=True)
    var = jnp.mean((y - mean) ** 2, axis=(0, 2, 3), keepdims=True)
    yhat = (y - mean) / jnp.sqrt(var + BN_EPS)
    return yhat * params["bn_gamma"][None, :, None, None] + \
        params["bn_beta"][None, :, None, None]


def make_params(key, in_channels, out_channels):
    k = jax.random.split(key, 6)
    return {
        # ConvTranspose2d(in, out, 1, 1, 0): weight (C_in, C_out, 1, 1), bias (C_out,)
        "trans_w": 0.1 * jax.random.normal(k[0], (in_channels, out_channels, 1, 1), jnp.float32),
        "trans_b": 0.1 * jax.random.normal(k[1], (out_channels,), jnp.float32),
        # Conv2d(in, out, 1, 1, 0): weight (C_out, C_in, 1, 1), bias (C_out,)
        "conv_w": 0.1 * jax.random.normal(k[2], (out_channels, in_channels, 1, 1), jnp.float32),
        "conv_b": 0.1 * jax.random.normal(k[3], (out_channels,), jnp.float32),
        # BatchNorm2d(out_channels) affine params
        "bn_gamma": 1.0 + 0.05 * jax.random.normal(k[4], (out_channels,), jnp.float32),
        "bn_beta": 0.05 * jax.random.normal(k[5], (out_channels,), jnp.float32),
    }


if __name__ == "__main__":
    key = jax.random.PRNGKey(0)
    fwd = jax.jit(up_or_trans_forward,
                  static_argnames=("mode", "scale_factor", "compute_dtype",
                                   "force_impl", "lane_tile"))

    cases = (
        # (N, C_in, C_out, H, W), modes,            kwargs,                                tol
        ((2, 4, 8, 16, 16), ("trans", "up"), {},                                           1e-3),  # fused path, LT=HW
        ((2, 4, 8, 16, 16), ("trans",),      {"force_impl": "two_pass"},                   1e-3),  # two-pass path
        ((2, 4, 8, 64, 64), ("trans",),      {"lane_tile": 1024},                          1e-3),  # fused, 4 spatial tiles
        ((2, 4, 8, 64, 64), ("trans",),      {"force_impl": "two_pass", "lane_tile": 1024}, 1e-3), # two-pass, accumulation over l
        ((2, 4, 8, 64, 64), ("up",),         {"compute_dtype": jnp.bfloat16},              1e-1),  # bf16 MXU operands
    )

    ok = True
    for idx, ((N, C_IN, C_OUT, H, W), modes, kw, tol) in enumerate(cases):
        kx, kp = jax.random.split(jax.random.fold_in(key, idx))
        x = jax.random.normal(kx, (N, C_IN, H, W), jnp.float32)
        params = make_params(kp, C_IN, C_OUT)
        for mode in modes:
            out = jax.block_until_ready(fwd(x, params, mode=mode, **kw))
            ref = _reference_forward(x, params, mode=mode)
            sf = 1 if mode == "trans" else 2
            if out.shape != (N, C_OUT, sf * H, sf * W):
                ok = False
            if not jnp.allclose(out, ref, atol=tol, rtol=tol):
                ok = False

    if ok:
        print("KERNEL_OK")
    else:
        print("KERNEL_MISMATCH")
</pallas_src>

<mosaic_0001>
module attributes {stable_mosaic.version = 11 : i64} {
  func.func @_fused_kernel(%arg0: i32, %arg1: i32, %arg2: i32, %arg3: memref<1x4x256xf32, #tpu.memory_space<vmem>>, %arg4: memref<8x4xf32, #tpu.memory_space<vmem>>, %arg5: memref<8x1xf32, #tpu.memory_space<vmem>>, %arg6: memref<8x1xf32, #tpu.memory_space<vmem>>, %arg7: memref<1x8x256xf32, #tpu.memory_space<vmem>>, %arg8: memref<8x1xf32, #tpu.memory_space<vmem>>, %arg9: memref<8x1xf32, #tpu.memory_space<vmem>>, %arg10: memref<8x1xf32, #tpu.memory_space<vmem>>, %arg11: memref<8x1xf32, #tpu.memory_space<vmem>>) attributes {dimension_semantics = [#tpu.dimension_semantics<arbitrary>, #tpu.dimension_semantics<arbitrary>, #tpu.dimension_semantics<arbitrary>], iteration_bounds = array<i64: 2, 2, 1>, scalar_prefetch = 0 : i64, scratch_operands = 4 : i64, tpu.core_type = #tpu.core_type<tc>, window_params = [{transform_indices = @transform_0, window_bounds = array<i64: 1, 4, 256>}, {pipeline_mode = #tpu.pipeline_mode<synchronous>, transform_indices = @transform_1, window_bounds = array<i64: 8, 4>}, {pipeline_mode = #tpu.pipeline_mode<synchronous>, transform_indices = @transform_2, window_bounds = array<i64: 8, 1>}, {pipeline_mode = #tpu.pipeline_mode<synchronous>, transform_indices = @transform_3, window_bounds = array<i64: 8, 1>}, {transform_indices = @transform_4, window_bounds = array<i64: 1, 8, 256>}]} {
    %c0_i32 = arith.constant 0 : i32
    %0 = arith.cmpi eq, %arg1, %c0_i32 : i32
    %c0_i32_0 = arith.constant 0 : i32
    %1 = arith.cmpi eq, %arg2, %c0_i32_0 : i32
    %2 = arith.andi %0, %1 : i1
    %c0_i32_1 = arith.constant 0 : i32
    %3 = arith.cmpi eq, %arg0, %c0_i32_1 : i32
    %4 = arith.andi %3, %2 : i1
    %5 = arith.extui %4 : i1 to i32
    %c0_i32_2 = arith.constant 0 : i32
    %6 = arith.cmpi ne, %5, %c0_i32_2 : i32
    scf.if %6 {
      %cst = arith.constant 0.000000e+00 : f32
      %17 = vector.broadcast %cst : f32 to vector<8x1xf32>
      %c0 = arith.constant 0 : index
      %c0_8 = arith.constant 0 : index
      %18 = vector.load %arg8[%c0, %c0_8] : memref<8x1xf32, #tpu.memory_space<vmem>>, vector<8x1xf32>
      tpu.vector_store %arg8[%c0, %c0_8], %17 {strides = array<i32>} : memref<8x1xf32, #tpu.memory_space<vmem>>, vector<8x1xf32>,
      %cst_9 = arith.constant 0.000000e+00 : f32
      %19 = vector.broadcast %cst_9 : f32 to vector<8x1xf32>
      %c0_10 = arith.constant 0 : index
      %c0_11 = arith.constant 0 : index
      %20 = vector.load %arg9[%c0_10, %c0_11] : memref<8x1xf32, #tpu.memory_space<vmem>>, vector<8x1xf32>
      tpu.vector_store %arg9[%c0_10, %c0_11], %19 {strides = array<i32>} : memref<8x1xf32, #tpu.memory_space<vmem>>, vector<8x1xf32>,
    } else {
    }
    %c0_i32_3 = arith.constant 0 : i32
    %7 = arith.cmpi eq, %arg0, %c0_i32_3 : i32
    %8 = arith.extui %7 : i1 to i32
    %c0_i32_4 = arith.constant 0 : i32
    %9 = arith.cmpi ne, %8, %c0_i32_4 : i32
    scf.if %9 {
      %c0 = arith.constant 0 : index
      %c0_8 = arith.constant 0 : index
      %17 = vector.load %arg4[%c0, %c0_8] : memref<8x4xf32, #tpu.memory_space<vmem>>, vector<8x4xf32>
      %c0_9 = arith.constant 0 : index
      %c0_10 = arith.constant 0 : index
      %c0_11 = arith.constant 0 : index
      %18 = vector.load %arg3[%c0_9, %c0_10, %c0_11] : memref<1x4x256xf32, #tpu.memory_space<vmem>>, vector<1x4x256xf32>
      %19 = vector.shape_cast %18 : vector<1x4x256xf32> to vector<4x256xf32>
      %cst = arith.constant dense<0.000000e+00> : vector<8x256xf32>
      %20 = tpu.matmul %17, %19, %cst {dimension_numbers = #tpu.dot_dimension_numbers<[1], [0], [0], [1], [0, 0, 1, 1], [], []>} : vector<8x4xf32>, vector<4x256xf32>, vector<8x256xf32> -> vector<8x256xf32>
      %c0_12 = arith.constant 0 : index
      %c0_13 = arith.constant 0 : index
      %21 = vector.load %arg8[%c0_12, %c0_13] : memref<8x1xf32, #tpu.memory_space<vmem>>, vector<8x1xf32>
      %cst_14 = arith.constant dense<0.000000e+00> : vector<8xf32>
      %22 = vector.multi_reduction <add>, %20, %cst_14 [1] : vector<8x256xf32> to vector<8xf32>
      %23 = vector.shape_cast %22 : vector<8xf32> to vector<8x1xf32>
      %24 = arith.addf %21, %23 : vector<8x1xf32>
      %c0_15 = arith.constant 0 : index
      %c0_16 = arith.constant 0 : index
      %25 = vector.load %arg8[%c0_15, %c0_16] : memref<8x1xf32, #tpu.memory_space<vmem>>, vector<8x1xf32>
      tpu.vector_store %arg8[%c0_15, %c0_16], %24 {strides = array<i32>} : memref<8x1xf32, #tpu.memory_space<vmem>>, vector<8x1xf32>,
      %c0_17 = arith.constant 0 : index
      %c0_18 = arith.constant 0 : index
      %26 = vector.load %arg9[%c0_17, %c0_18] : memref<8x1xf32, #tpu.memory_space<vmem>>, vector<8x1xf32>
      %27 = arith.mulf %20, %20 : vector<8x256xf32>
      %cst_19 = arith.constant dense<0.000000e+00> : vector<8xf32>
      %28 = vector.multi_reduction <add>, %27, %cst_19 [1] : vector<8x256xf32> to vector<8xf32>
      %29 = vector.shape_cast %28 : vector<8xf32> to vector<8x1xf32>
      %30 = arith.addf %26, %29 : vector<8x1xf32>
      %c0_20 = arith.constant 0 : index
      %c0_21 = arith.constant 0 : index
      %31 = vector.load %arg9[%c0_20, %c0_21] : memref<8x1xf32, #tpu.memory_space<vmem>>, vector<8x1xf32>
      tpu.vector_store %arg9[%c0_20, %c0_21], %30 {strides = array<i32>} : memref<8x1xf32, #tpu.memory_space<vmem>>, vector<8x1xf32>,
    } else {
    }
    %c1_i32 = arith.constant 1 : i32
    %10 = arith.cmpi eq, %arg0, %c1_i32 : i32
    %11 = arith.andi %10, %2 : i1
    %12 = arith.extui %11 : i1 to i32
    %c0_i32_5 = arith.constant 0 : i32
    %13 = arith.cmpi ne, %12, %c0_i32_5 : i32
    scf.if %13 {
      %c0 = arith.constant 0 : index
      %c0_8 = arith.constant 0 : index
      %17 = vector.load %arg8[%c0, %c0_8] : memref<8x1xf32, #tpu.memory_space<vmem>>, vector<8x1xf32>
      %cst = arith.constant 5.120000e+02 : f32
      %18 = vector.broadcast %cst : f32 to vector<8x1xf32>
      %19 = arith.divf %17, %18 : vector<8x1xf32>
      %c0_9 = arith.constant 0 : index
      %c0_10 = arith.constant 0 : index
      %20 = vector.load %arg9[%c0_9, %c0_10] : memref<8x1xf32, #tpu.memory_space<vmem>>, vector<8x1xf32>
      %cst_11 = arith.constant 5.120000e+02 : f32
      %21 = vector.broadcast %cst_11 : f32 to vector<8x1xf32>
      %22 = arith.divf %20, %21 : vector<8x1xf32>
      %23 = arith.mulf %19, %19 : vector<8x1xf32>
      %24 = arith.subf %22, %23 : vector<8x1xf32>
      %c0_12 = arith.constant 0 : index
      %c0_13 = arith.constant 0 : index
      %25 = vector.load %arg5[%c0_12, %c0_13] : memref<8x1xf32, #tpu.memory_space<vmem>>, vector<8x1xf32>
      %cst_14 = arith.constant 9.99999974E-6 : f32
      %26 = vector.broadcast %cst_14 : f32 to vector<8x1xf32>
      %27 = arith.addf %24, %26 : vector<8x1xf32>
      %28 = math.rsqrt %27 : vector<8x1xf32>
      %29 = arith.mulf %25, %28 : vector<8x1xf32>
      %c0_15 = arith.constant 0 : index
      %c0_16 = arith.constant 0 : index
      %30 = vector.load %arg10[%c0_15, %c0_16] : memref<8x1xf32, #tpu.memory_space<vmem>>, vector<8x1xf32>
      tpu.vector_store %arg10[%c0_15, %c0_16], %29 {strides = array<i32>} : memref<8x1xf32, #tpu.memory_space<vmem>>, vector<8x1xf32>,
      %c0_17 = arith.constant 0 : index
      %c0_18 = arith.constant 0 : index
      %31 = vector.load %arg6[%c0_17, %c0_18] : memref<8x1xf32, #tpu.memory_space<vmem>>, vector<8x1xf32>
      %32 = arith.mulf %19, %29 : vector<8x1xf32>
      %33 = arith.subf %31, %32 : vector<8x1xf32>
      %c0_19 = arith.constant 0 : index
      %c0_20 = arith.constant 0 : index
      %34 = vector.load %arg11[%c0_19, %c0_20] : memref<8x1xf32, #tpu.memory_space<vmem>>, vector<8x1xf32>
      tpu.vector_store %arg11[%c0_19, %c0_20], %33 {strides = array<i32>} : memref<8x1xf32, #tpu.memory_space<vmem>>, vector<8x1xf32>,
    } else {
    }
    %c1_i32_6 = arith.constant 1 : i32
    %14 = arith.cmpi eq, %arg0, %c1_i32_6 : i32
    %15 = arith.extui %14 : i1 to i32
    %c0_i32_7 = arith.constant 0 : i32
    %16 = arith.cmpi ne, %15, %c0_i32_7 : i32
    scf.if %16 {
      %c0 = arith.constant 0 : index
      %c0_8 = arith.constant 0 : index
      %17 = vector.load %arg4[%c0, %c0_8] : memref<8x4xf32, #tpu.memory_space<vmem>>, vector<8x4xf32>
      %c0_9 = arith.constant 0 : index
      %c0_10 = arith.constant 0 : index
      %18 = vector.load %arg10[%c0_9, %c0_10] : memref<8x1xf32, #tpu.memory_space<vmem>>, vector<8x1xf32>
      %19 = vector.broadcast %18 : vector<8x1xf32> to vector<8x4xf32>
      %20 = arith.mulf %17, %19 : vector<8x4xf32>
      %c0_11 = arith.constant 0 : index
      %c0_12 = arith.constant 0 : index
      %c0_13 = arith.constant 0 : index
      %21 = vector.load %arg3[%c0_11, %c0_12, %c0_13] : memref<1x4x256xf32, #tpu.memory_space<vmem>>, vector<1x4x256xf32>
      %22 = vector.shape_cast %21 : vector<1x4x256xf32> to vector<4x256xf32>
      %cst = arith.constant dense<0.000000e+00> : vector<8x256xf32>
      %23 = tpu.matmul %20, %22, %cst {dimension_numbers = #tpu.dot_dimension_numbers<[1], [0], [0], [1], [0, 0, 1, 1], [], []>} : vector<8x4xf32>, vector<4x256xf32>, vector<8x256xf32> -> vector<8x256xf32>
      %c0_14 = arith.constant 0 : index
      %c0_15 = arith.constant 0 : index
      %24 = vector.load %arg11[%c0_14, %c0_15] : memref<8x1xf32, #tpu.memory_space<vmem>>, vector<8x1xf32>
      %25 = vector.broadcast %24 : vector<8x1xf32> to vector<8x256xf32>
      %26 = arith.addf %23, %25 : vector<8x256xf32>
      %c0_16 = arith.constant 0 : index
      %c0_17 = arith.constant 0 : index
      %c0_18 = arith.constant 0 : index
      %27 = vector.load %arg7[%c0_16, %c0_17, %c0_18] : memref<1x8x256xf32, #tpu.memory_space<vmem>>, vector<1x8x256xf32>
      %28 = vector.shape_cast %27 : vector<1x8x256xf32> to vector<8x256xf32>
      %29 = vector.shape_cast %26 : vector<8x256xf32> to vector<1x8x256xf32>
      tpu.vector_store %arg7[%c0_16, %c0_17, %c0_18], %29 {strides = array<i32>} : memref<1x8x256xf32, #tpu.memory_space<vmem>>, vector<1x8x256xf32>,
    } else {
    }
    return
  }
  func.func @transform_0(%arg0: i32, %arg1: i32, %arg2: i32) -> (i32, i32, i32) {
    %c0_i32 = arith.constant 0 : i32
    %c0_i32_0 = arith.constant 0 : i32
    return %arg1, %c0_i32, %arg2 : i32, i32, i32
  }
  func.func @transform_1(%arg0: i32, %arg1: i32, %arg2: i32) -> (i32, i32) {
    %c0_i32 = arith.constant 0 : i32
    %c0_i32_0 = arith.constant 0 : i32
    %c0_i32_1 = arith.constant 0 : i32
    return %c0_i32, %c0_i32_0 : i32, i32
  }
  func.func @transform_2(%arg0: i32, %arg1: i32, %arg2: i32) -> (i32, i32) {
    %c0_i32 = arith.constant 0 : i32
    %c0_i32_0 = arith.constant 0 : i32
    %c0_i32_1 = arith.constant 0 : i32
    return %c0_i32, %c0_i32_0 : i32, i32
  }
  func.func @transform_3(%arg0: i32, %arg1: i32, %arg2: i32) -> (i32, i32) {
    %c0_i32 = arith.constant 0 : i32
    %c0_i32_0 = arith.constant 0 : i32
    %c0_i32_1 = arith.constant 0 : i32
    return %c0_i32, %c0_i32_0 : i32, i32
  }
  func.func @transform_4(%arg0: i32, %arg1: i32, %arg2: i32) -> (i32, i32, i32) {
    %0 = arith.muli %arg1, %arg0 : i32
    %1 = arith.muli %arg2, %arg0 : i32
    %c0_i32 = arith.constant 0 : i32
    %c0_i32_0 = arith.constant 0 : i32
    return %0, %c0_i32, %1 : i32, i32, i32
  }
}

</mosaic_0001>

<bundles_post_ra>
// kernel: up_or_trans_forward.1
= control target key start
LH: loop header
LB: loop body
LE: loop exit
PB: predicated region body
PF: predicated region fallthrough
CT: control target
= control target key end

     0   :  { %s732_s15 = smov 0   ;;  %s734_s16 = smov 0   ;;  %s820_s0 = inlined_call_operand.vmem [shape: f32[2,4,256], index: 0, kind: input, shape index: {}]   ;;  %s821_s1 = inlined_call_operand.vmem [shape: f32[8,4], index: 1, kind: input, shape index: {}]   ;;  %s822_s2 = inlined_call_operand.vmem [shape: f32[8,1], index: 2, kind: input, shape index: {}]   ;;  %s823_s3 = inlined_call_operand.vmem [shape: f32[8,1], index: 3, kind: input, shape index: {}]   ;;  %s824_s4 = inlined_call_operand.vmem [shape: f32[2,8,256], index: 4, kind: output, shape index: {}]  }
   0x1   :  { %s736_s17 = smov 0   ;;  %s738_s18 = smov 0  }
   0x2   :  { %s740_s19 = smov 0  }
   0x3 LB: > { %s29_s20 = sadd.s32 1, %s693_s17  ;;  %s33_s21 = sadd.s32 1, %s697_s18  ;;  %s701_s19 = sphi %s740_s19, %s14_s19   ;;  %s697_s18 = sphi %s738_s18, %s828_s18   ;;  %s693_s17 = sphi %s736_s17, %s827_s17   ;;  %s689_s16 = sphi %s734_s16, %s826_s16   ;;  %s685_s15 = sphi %s732_s15, %s825_s15  }
   0x4   : > { %p31_p0 = scmp.ge.s32.totalorder %s29_s20, 2  ;;  %p595_p1 = scmp.ge.s32.totalorder %s701_s19, 1 }
   0x5   : > { %p194_p2 = scmp.lt.s32.totalorder %s701_s19, 5 }
   0x6   : > { %s830_s20 = smov (%p31_p0, %s29_s20), 0  ;;  %s832_s21 = smov (!%p31_p0, %s33_s21), %s697_s18 }
   0x7   : > { %p195_p3 = pnand %p595_p1, %p194_p2  ;;  %p35_p4 = scmp.ge.s32.totalorder %s832_s21, 2 }
   0x8   : > { %p231_p5 = scmp.lt.s32.totalorder (!%p195_p3), %s685_s15, 1  ;;  %s240_s22 = smul.u32 (!%p195_p3), %s685_s15, %s689_s16 }
   0x9   : > { %s834_s21 = smov (%p35_p4, %s832_s21), 0  ;;  %198 = sbr.rel (%p195_p3) target bundleno = 774 (0x306), region = 36 }
   0xa   : > { %p254_p6 = scmp.eq.s32.totalorder (!%p195_p3), %s685_s15, 0  ;;  %p258_p7 = scmp.eq.s32.totalorder (!%p195_p3), %s689_s16, 0 }
   0xb   : > { %p243_p8 = scmp.lt.s32.totalorder (!%p195_p3), %s240_s22, 1 }
   0xc   : > { %p259_p9 = pnand (!%p195_p3), %p258_p7, %p254_p6 }
  0x10   : > { %s232_s23 = scalar_select %p231_p5, %s685_s15, 1 }
  0x11   : > { %s836_s22 = smov (!%p243_p8, %s240_s22), 1  ;;  %262 = sbr.rel (%p259_p9) target bundleno = 24 (0x18), region = 40 }
  0x12   : > { %s611_s24 = sshll.u32 %s232_s23, 3  ;;  %s612_s28 = sshll.u32 %s836_s22, 4  ;;  %vm263_vm0 = vcmask (!%p259_p9), 7168   ;;  %v703_v0 = vmov (!%p259_p9), 0.0  }
  0x13   : > { %s777_s27 = scalar_lea.vmem %s820_s0, %s611_s24  ;;  %s782_s5 = scalar_lea.vmem %s824_s4, %s612_s28  ;;  %264 = vst.msk [vmem:[#allocation2] sm:$0xff] (!%p259_p9), %vm263_vm0, %v703_v0  ;;  %265 = vst.msk [vmem:[#allocation3] sm:$0xff] (!%p259_p9), %vm263_vm0, %v703_v0 }
  0x18 PF: > { %p601_p10 = scmp.ne.s32.totalorder %s689_s16, 0 }
  0x19   : > { %v270_v1 = vld [vmem:[%s777_s27] sm:$0xff] (!%p601_p10)  ;;  %vm277_vm1 = vcmask (!%p601_p10), 1043456   ;;  %v704_v3 = vmov (!%p601_p10), 0.0   ;;  %vm273_vm2 = vcmask (!%p601_p10), 31744   ;;  %vm358_vm3 = vcmask (!%p601_p10), 7168  }
  0x1a   : > { %268 = sbr.rel (%p601_p10) target bundleno = 394 (0x18a), region = 44  ;;  %v272_v2 = vcombine.high (!%p601_p10), %v270_v1, %v270_v1  ;;  %346 = vmatprep.mubr.f32.mxu0 (!%p601_p10), %v704_v3  ;;  %v269_v4 = vld [vmem:[%s821_s1] sm:$0xff] (!%p601_p10)  ;;  %v360_v14 = vld [vmem:[#allocation3] sm:$0xff] (!%p601_p10) }
  0x1b   : > { %v353_v11 = vld [vmem:[#allocation2] sm:$0xff] (!%p601_p10) }
  0x1c   : > { %602 = vmatprep.subr.msk.mxu0 (!%p601_p10), %vm277_vm1, %v272_v2 }
  0x1d   : > { %603 = vmatpush1.msk.msra.mxu0 (!%p601_p10), %vm277_vm1, %v270_v1 }
  0x1e   : > { %604 = vmatmul.mubr.msk.f32.vlgmr.msra.gmra.mrb[0].mxu0 (!%p601_p10), %vm273_vm2, %v269_v4 }
  0xf1   : > { %v348_v5 = vpop.f32.mrb[0].mxu0 }
  0xf2   : > { %v361_v6 = vmul.f32 %v348_v5, %v348_v5  ;;  %v350_v7 = vpop.f32.mrb[1].mxu0 }
  0xf3   : > { %v362_v8 = vmul.f32 %v350_v7, %v350_v7  ;;  %v354_v9 = vadd.f32 %v350_v7, %v348_v5 }
  0xf5   : > { %355 = vadd.xlane.f32.xlu0 %v354_v9  ;;  %v363_v10 = vadd.f32 %v362_v8, %v361_v6 }
  0xf9   : > { %364 = vadd.xlane.f32.xlu0 %v363_v10 }
 0x182   : > { %v356_v12 = vpop.xlane.xlu0 %355 }
 0x183   : > { %v357_v13 = vadd.f32 %v356_v12, %v353_v11 }
 0x185   : > { %359 = vst.msk [vmem:[#allocation2] sm:$0xff] %vm358_vm3, %v357_v13 }
 0x186   : > { %v365_v15 = vpop.xlane.xlu0 %364 }
 0x187   : > { %v366_v16 = vadd.f32 %v365_v15, %v360_v14 }
 0x189   : > { %367 = vst.msk [vmem:[#allocation3] sm:$0xff] %vm358_vm3, %v366_v16 }
 0x18a PF: > { %p368_p11 = scmp.eq.s32.totalorder %s689_s16, 1 }
 0x18c   : > { %p369_p12 = pnand %p368_p11, %p254_p6 }
 0x18d   : > { %v373_v17 = vld [vmem:[#allocation2] sm:$0xff] (!%p369_p12)  ;;  %vm384_vm4 = vcmask (!%p369_p12), 7168  }
 0x18e   : > { %372 = sbr.rel (%p369_p12) target bundleno = 425 (0x1a9), region = 48  ;;  %v375_v19 = vmul.f32 (!%p369_p12), 0.001953125, %v373_v17  ;;  %v380_v24 = vld [vmem:[%s822_s2] sm:$0xff] (!%p369_p12) }
 0x18f   : > { %v386_v27 = vld [vmem:[%s823_s3] sm:$0xff] (!%p369_p12) }
 0x190   : > { %v376_v18 = vld [vmem:[#allocation3] sm:$0xff] (!%p369_p12)  ;;  %v378_v21 = vmul.f32 (!%p369_p12), %v375_v19, %v375_v19 }
 0x191   : > { %v377_v20 = vmul.f32 (!%p369_p12), 0.001953125, %v376_v18 }
 0x193   : > { %v379_v22 = vsub.f32 (!%p369_p12), %v377_v20, %v378_v21 }
 0x195   : > { %v381_v23 = vadd.f32 1e-05, %v379_v22 }
 0x197   : > { %659 = vrsqrt.f32 %v381_v23 }
 0x1a1   : > { %v660_v25 = vpop.eup %659 }
 0x1a2   : > { %v383_v26 = vmul.f32 %v660_v25, %v380_v24 }
 0x1a4   : > { %385 = vst.msk [vmem:[#allocation4] sm:$0xff] %vm384_vm4, %v383_v26  ;;  %v387_v28 = vmul.f32 %v383_v26, %v375_v19 }
 0x1a6   : > { %v388_v29 = vsub.f32 %v386_v27, %v387_v28 }
 0x1a8   : > { %389 = vst.msk [vmem:[#allocation5] sm:$0xff] %vm384_vm4, %v388_v29 }
 0x1a9 PF: > { %p605_p13 = scmp.ne.s32.totalorder %s689_s16, 1 }
 0x1aa   : > { %v401_v31 = vld [vmem:[%s777_s27] sm:$0xff] (!%p605_p13)  ;;  %v705_v32 = vmov (!%p605_p13), 0   ;;  %vm414_vm5 = vcmask (!%p605_p13), 1043456   ;;  %v706_v35 = vmov (!%p605_p13), 0.0   ;;  %vm410_vm6 = vcmask (!%p605_p13), 31744  }
 0x1ab   : > { %392 = sbr.rel (%p605_p13) target bundleno = 774 (0x306), region = 52  ;;  %v394_v30 = vld [vmem:[#allocation4] sm:$0xff] (!%p605_p13)  ;;  %661 = vset.pattern.permute.xlu0 (!%p605_p13), %v705_v32  ;;  %v409_v33 = vcombine.high (!%p605_p13), %v401_v31, %v401_v31  ;;  %483 = vmatprep.mubr.f32.mxu0 (!%p605_p13), %v706_v35  ;;  %v393_v36 = vld [vmem:[%s821_s1] sm:$0xff] (!%p605_p13) }
 0x1ac   : > { %397 = vperm.xlu0 (!%p605_p13), %661, %v394_v30  }
 0x1ad   : > { %606 = vmatprep.subr.msk.mxu0 (!%p605_p13), %vm414_vm5, %v409_v33 }
 0x1ae   : > { %607 = vmatpush1.msk.msra.mxu0 (!%p605_p13), %vm414_vm5, %v401_v31 }
 0x1af   : > { %v402_v34 = vld [vmem:[#allocation5] sm:$0xff] (!%p605_p13) }
 0x1b0   : > { %405 = vperm.xlu0 (!%p605_p13), %661, %v402_v34  }
 0x22b   : > { %v398_v37 = vpop.permute.xlu0 %397 }
 0x22c   : > { %v400_v38 = vmul.f32 %v398_v37, %v393_v36 }
 0x22e   : > { %608 = vmatmul.mubr.msk.f32.vlgmr.msra.gmra.mrb[0].mxu0 %vm410_vm6, %v400_v38 }
 0x22f   : > { %v406_v39 = vpop.permute.xlu0 %405 }
 0x301   : > { %v485_v40 = vpop.f32.mrb[0].mxu0 }
 0x302   : > { %v486_v41 = vadd.f32 %v485_v40, %v406_v39  ;;  %v487_v42 = vpop.f32.mrb[1].mxu0 }
 0x303   : > { %v488_v43 = vadd.f32 %v487_v42, %v406_v39 }
 0x304   : > { %490 = vst [vmem:[%s782_s5] sm:$0xff] %v486_v41 }
 0x305   : > { %491 = vst [vmem:[%s782_s5 + $0x8] sm:$0xff] %v488_v43 }
 0x306 PF: > { %s14_s19 = sadd.s32 1, %s701_s19   ;;  %s825_s15 = smov %s693_s17 }
 0x307   : > { %p11_p0 = scmp.ge.s32.totalorder %s14_s19, 6   ;;  %s826_s16 = smov %s697_s18 }
 0x308   : > { %s827_s17 = smov %s830_s20  ;;  %s828_s18 = smov %s834_s21 }
 0x309   :  { %13 = sbr.rel (!%p11_p0) target bundleno = 3 (0x3), region = 82 }

</bundles_post_ra>
